<compile_context>
chip_gen: v7x
topology: tpu7x:2x2x1
jax: 0.10.0
libtpu: 0.0.40
codegen_flags: <defaults>
</compile_context>

<pallas_src>
import functools

import jax
import jax.numpy as jnp
from jax.experimental import pallas as pl
from jax.experimental.pallas import tpu as pltpu

# PyTorch layer dims: Linear(16,64), (64,96), (96,96), (96,64), (64,4)
_LAYER_DIMS = [(16, 64), (64, 96), (96, 96), (96, 64), (64, 4)]
_NUM_LAYERS = len(_LAYER_DIMS)
_IN_DIM = _LAYER_DIMS[0][0]         # 16
_OUT_DIM = _LAYER_DIMS[-1][1]       # 4
_PAD = 128                          # lane width; weight blocks padded to 128x128
_W_SLAB_ROWS = _NUM_LAYERS * _PAD   # 640 rows, one 128x128 block per layer
_B_SLAB_ROWS = 8                    # 5 bias rows, padded to a sublane multiple


def _round_up(x, m):
    return (x + m - 1) // m * m


def qnet_kernel(x_ref, w_ref, b_ref, o_ref):
    """Fused 5-layer MLP on one (TB, 16) batch tile.

    x_ref: (TB, 16)  bf16 -- unpadded network input tile.
    w_ref: (640,128) bf16 -- layer l weight in rows [l*128, l*128+in_d), cols [:out_d),
                             zeros elsewhere.
    b_ref: (8, 128)  f32  -- layer l bias in row l, cols [:out_d), zeros elsewhere.
    o_ref: (TB, 4)   f32  -- Q-values (narrow, lane-masked store).
    """
    # Layer 0: (TB,16) @ (16,128) -- explicit 16-row weight slice, no zero-padded x.
    acc = jnp.dot(x_ref[...], w_ref[pl.ds(0, _IN_DIM), :],
                  preferred_element_type=jnp.float32) + b_ref[pl.ds(0, 1), :]
    h = jnp.maximum(acc, 0.0).astype(jnp.bfloat16)          # (TB,128) bf16 activations

    for l in range(1, _NUM_LAYERS):
        w = w_ref[pl.ds(l * _PAD, _PAD), :]                 # (128,128) bf16, static view
        b = b_ref[pl.ds(l, 1), :]                           # (1,128) f32
        acc = jnp.dot(h, w, preferred_element_type=jnp.float32) + b
        if l < _NUM_LAYERS - 1:                             # ReLU on hidden layers only
            h = jnp.maximum(acc, 0.0).astype(jnp.bfloat16)

    o_ref[...] = acc[:, :_OUT_DIM]                          # final layer, no ReLU


def init_params(key):
    """PyTorch-default-style init. Weights stored as (in, out) == weight.T,
    biases as (1, out), all f32 (the 'master' copy)."""
    params = {}
    for i, (fan_in, fan_out) in enumerate(_LAYER_DIMS, start=1):
        key, kw, kb = jax.random.split(key, 3)
        bound = 1.0 / jnp.sqrt(fan_in)
        params[f"w{i}"] = jax.random.uniform(
            kw, (fan_in, fan_out), jnp.float32, -bound, bound)
        params[f"b{i}"] = jax.random.uniform(
            kb, (1, fan_out), jnp.float32, -bound, bound)
    return params


def pack_params(params):
    """Pack the 10 arrays into one bf16 weight slab + one f32 bias slab.

    Each layer's weight occupies a zero-padded 128x128 block so the kernel runs
    identical lane-dense (TB,128)@(128,128) matmuls (layer 0 slices 16 rows)."""
    w_slab = jnp.zeros((_W_SLAB_ROWS, _PAD), jnp.bfloat16)
    b_slab = jnp.zeros((_B_SLAB_ROWS, _PAD), jnp.float32)
    for l, (fan_in, fan_out) in enumerate(_LAYER_DIMS):
        w = params[f"w{l + 1}"].astype(jnp.bfloat16)
        b = params[f"b{l + 1}"].reshape(fan_out)
        w_slab = w_slab.at[l * _PAD:l * _PAD + fan_in, :fan_out].set(w)
        b_slab = b_slab.at[l, :fan_out].set(b)
    return w_slab, b_slab


def _pick_tile(batch, block_b, target_steps=4):
    """Batch-tile rows: one tile for small B; otherwise >= target_steps grid steps
    of near-equal size (multiple of 8, <= block_b) to amortize per-step overhead,
    keep the pipeline fed, avoid near-full-tile padding, and let v7x megacore
    shard the 'parallel' batch axis across both TensorCores."""
    rows8 = _round_up(batch, 8)
    if rows8 <= block_b:
        return rows8
    steps = max(target_steps, pl.cdiv(rows8, block_b))
    return min(block_b, _round_up(pl.cdiv(rows8, steps), 8))


@functools.partial(jax.jit, static_argnames=("block_b",))
def qnet_forward_packed(x, w_slab, b_slab, *, block_b=1024):
    """x: (B, 16) f32 (or bf16). Returns (B, 4) f32 Q-values."""
    B = x.shape[0]
    block_b = _round_up(block_b, 8)
    tb = _pick_tile(B, block_b)
    padded_b = _round_up(B, tb)

    # MXU operand dtype; no 128-lane pad and no pad HLO at all when B is a tile multiple.
    x_bf = x.astype(jnp.bfloat16)
    if padded_b != B:
        x_bf = jnp.pad(x_bf, ((0, padded_b - B), (0, 0)))

    flops = 2 * padded_b * sum(fi * fo for fi, fo in _LAYER_DIMS)
    bytes_accessed = (padded_b * _IN_DIM * 2          # bf16 input
                      + padded_b * _OUT_DIM * 4       # f32 output
                      + w_slab.size * 2 + b_slab.size * 4)

    grid = (padded_b // tb,)
    out = pl.pallas_call(
        qnet_kernel,
        out_shape=jax.ShapeDtypeStruct((padded_b, _OUT_DIM), jnp.float32),
        grid=grid,
        in_specs=[
            pl.BlockSpec((tb, _IN_DIM), lambda i: (i, 0)),              # x tile, unpadded lanes
            pl.BlockSpec((_W_SLAB_ROWS, _PAD), lambda i: (0, 0)),       # weights (resident)
            pl.BlockSpec((_B_SLAB_ROWS, _PAD), lambda i: (0, 0)),       # biases  (resident)
        ],
        out_specs=pl.BlockSpec((tb, _OUT_DIM), lambda i: (i, 0)),       # narrow Q-value slab
        compiler_params=pltpu.CompilerParams(
            dimension_semantics=("parallel",)),                         # megacore on v7x
        cost_estimate=pl.CostEstimate(flops=flops, transcendentals=0,
                                      bytes_accessed=bytes_accessed),
    )(x_bf, w_slab, b_slab)

    return out[:B]


def qnet_reference(x, params):
    """Pure-JAX f32 reference matching the PyTorch forward."""
    h = x
    for i in range(1, 5):
        h = jnp.maximum(h @ params[f"w{i}"] + params[f"b{i}"], 0.0)
    return h @ params["w5"] + params["b5"]


if __name__ == "__main__":
    key = jax.random.PRNGKey(0)
    key, kx = jax.random.split(key)

    B = 8  # small batch (typical DQN acting)
    x = jax.random.normal(kx, (B, 16), jnp.float32)
    params = init_params(key)
    w_slab, b_slab = pack_params(params)

    y = qnet_forward_packed(x, w_slab, b_slab)
    y = jax.block_until_ready(y)

    y_ref = qnet_reference(x, params)
    assert y.shape == (B, 4)
    # bf16 matmul operands (f32 accumulation) => compare with a looser tolerance.
    assert jnp.allclose(y, y_ref, atol=5e-2, rtol=5e-2), (
        f"mismatch vs reference: max abs diff = {jnp.max(jnp.abs(y - y_ref))}")

    print("KERNEL_OK")
</pallas_src>

<mosaic_0001>
module attributes {stable_mosaic.version = 11 : i64} {
  func.func @qnet_kernel(%arg0: i32, %arg1: memref<8x16xbf16, #tpu.memory_space<vmem>>, %arg2: memref<640x128xbf16, #tpu.memory_space<vmem>>, %arg3: memref<8x128xf32, #tpu.memory_space<vmem>>, %arg4: memref<8x4xf32, #tpu.memory_space<vmem>>) attributes {dimension_semantics = [#tpu.dimension_semantics<parallel>], iteration_bounds = array<i64: 1>, scalar_prefetch = 0 : i64, scratch_operands = 0 : i64, tpu.core_type = #tpu.core_type<tc>, window_params = [{transform_indices = @transform_0, window_bounds = array<i64: 8, 16>}, {pipeline_mode = #tpu.pipeline_mode<synchronous>, transform_indices = @transform_1, window_bounds = array<i64: 640, 128>}, {pipeline_mode = #tpu.pipeline_mode<synchronous>, transform_indices = @transform_2, window_bounds = array<i64: 8, 128>}, {transform_indices = @transform_3, window_bounds = array<i64: 8, 4>}]} {
    %c0 = arith.constant 0 : index
    %c0_0 = arith.constant 0 : index
    %0 = vector.load %arg1[%c0, %c0_0] : memref<8x16xbf16, #tpu.memory_space<vmem>>, vector<8x16xbf16>
    %c0_1 = arith.constant 0 : index
    %c0_2 = arith.constant 0 : index
    %1 = vector.load %arg2[%c0_1, %c0_2] : memref<640x128xbf16, #tpu.memory_space<vmem>>, vector<16x128xbf16>
    %cst = arith.constant dense<0.000000e+00> : vector<8x128xf32>
    %2 = tpu.matmul %0, %1, %cst {dimension_numbers = #tpu.dot_dimension_numbers<[1], [0], [0], [1], [0, 0, 1, 1], [], []>} : vector<8x16xbf16>, vector<16x128xbf16>, vector<8x128xf32> -> vector<8x128xf32>
    %c0_3 = arith.constant 0 : index
    %c0_4 = arith.constant 0 : index
    %3 = vector.load %arg3[%c0_3, %c0_4] : memref<8x128xf32, #tpu.memory_space<vmem>>, vector<1x128xf32>
    %4 = vector.broadcast %3 : vector<1x128xf32> to vector<8x128xf32>
    %5 = arith.addf %2, %4 : vector<8x128xf32>
    %cst_5 = arith.constant 0.000000e+00 : f32
    %6 = vector.broadcast %cst_5 : f32 to vector<8x128xf32>
    %7 = arith.maximumf %5, %6 : vector<8x128xf32>
    %8 = arith.truncf %7 : vector<8x128xf32> to vector<8x128xbf16>
    %c128 = arith.constant 128 : index
    %c0_6 = arith.constant 0 : index
    %9 = vector.load %arg2[%c128, %c0_6] : memref<640x128xbf16, #tpu.memory_space<vmem>>, vector<128x128xbf16>
    %c1 = arith.constant 1 : index
    %c0_7 = arith.constant 0 : index
    %10 = vector.load %arg3[%c1, %c0_7] : memref<8x128xf32, #tpu.memory_space<vmem>>, vector<1x128xf32>
    %cst_8 = arith.constant dense<0.000000e+00> : vector<8x128xf32>
    %11 = tpu.matmul %8, %9, %cst_8 {dimension_numbers = #tpu.dot_dimension_numbers<[1], [0], [0], [1], [0, 0, 1, 1], [], []>} : vector<8x128xbf16>, vector<128x128xbf16>, vector<8x128xf32> -> vector<8x128xf32>
    %12 = vector.broadcast %10 : vector<1x128xf32> to vector<8x128xf32>
    %13 = arith.addf %11, %12 : vector<8x128xf32>
    %cst_9 = arith.constant 0.000000e+00 : f32
    %14 = vector.broadcast %cst_9 : f32 to vector<8x128xf32>
    %15 = arith.maximumf %13, %14 : vector<8x128xf32>
    %16 = arith.truncf %15 : vector<8x128xf32> to vector<8x128xbf16>
    %c256 = arith.constant 256 : index
    %c0_10 = arith.constant 0 : index
    %17 = vector.load %arg2[%c256, %c0_10] : memref<640x128xbf16, #tpu.memory_space<vmem>>, vector<128x128xbf16>
    %c2 = arith.constant 2 : index
    %c0_11 = arith.constant 0 : index
    %18 = vector.load %arg3[%c2, %c0_11] : memref<8x128xf32, #tpu.memory_space<vmem>>, vector<1x128xf32>
    %cst_12 = arith.constant dense<0.000000e+00> : vector<8x128xf32>
    %19 = tpu.matmul %16, %17, %cst_12 {dimension_numbers = #tpu.dot_dimension_numbers<[1], [0], [0], [1], [0, 0, 1, 1], [], []>} : vector<8x128xbf16>, vector<128x128xbf16>, vector<8x128xf32> -> vector<8x128xf32>
    %20 = vector.broadcast %18 : vector<1x128xf32> to vector<8x128xf32>
    %21 = arith.addf %19, %20 : vector<8x128xf32>
    %cst_13 = arith.constant 0.000000e+00 : f32
    %22 = vector.broadcast %cst_13 : f32 to vector<8x128xf32>
    %23 = arith.maximumf %21, %22 : vector<8x128xf32>
    %24 = arith.truncf %23 : vector<8x128xf32> to vector<8x128xbf16>
    %c384 = arith.constant 384 : index
    %c0_14 = arith.constant 0 : index
    %25 = vector.load %arg2[%c384, %c0_14] : memref<640x128xbf16, #tpu.memory_space<vmem>>, vector<128x128xbf16>
    %c3 = arith.constant 3 : index
    %c0_15 = arith.constant 0 : index
    %26 = vector.load %arg3[%c3, %c0_15] : memref<8x128xf32, #tpu.memory_space<vmem>>, vector<1x128xf32>
    %cst_16 = arith.constant dense<0.000000e+00> : vector<8x128xf32>
    %27 = tpu.matmul %24, %25, %cst_16 {dimension_numbers = #tpu.dot_dimension_numbers<[1], [0], [0], [1], [0, 0, 1, 1], [], []>} : vector<8x128xbf16>, vector<128x128xbf16>, vector<8x128xf32> -> vector<8x128xf32>
    %28 = vector.broadcast %26 : vector<1x128xf32> to vector<8x128xf32>
    %29 = arith.addf %27, %28 : vector<8x128xf32>
    %cst_17 = arith.constant 0.000000e+00 : f32
    %30 = vector.broadcast %cst_17 : f32 to vector<8x128xf32>
    %31 = arith.maximumf %29, %30 : vector<8x128xf32>
    %32 = arith.truncf %31 : vector<8x128xf32> to vector<8x128xbf16>
    %c512 = arith.constant 512 : index
    %c0_18 = arith.constant 0 : index
    %33 = vector.load %arg2[%c512, %c0_18] : memref<640x128xbf16, #tpu.memory_space<vmem>>, vector<128x128xbf16>
    %c4 = arith.constant 4 : index
    %c0_19 = arith.constant 0 : index
    %34 = vector.load %arg3[%c4, %c0_19] : memref<8x128xf32, #tpu.memory_space<vmem>>, vector<1x128xf32>
    %cst_20 = arith.constant dense<0.000000e+00> : vector<8x128xf32>
    %35 = tpu.matmul %32, %33, %cst_20 {dimension_numbers = #tpu.dot_dimension_numbers<[1], [0], [0], [1], [0, 0, 1, 1], [], []>} : vector<8x128xbf16>, vector<128x128xbf16>, vector<8x128xf32> -> vector<8x128xf32>
    %36 = vector.broadcast %34 : vector<1x128xf32> to vector<8x128xf32>
    %37 = arith.addf %35, %36 : vector<8x128xf32>
    %38 = vector.extract_strided_slice %37 {offsets = [0, 0], sizes = [8, 4], strides = [1, 1]} : vector<8x128xf32> to vector<8x4xf32>
    %c0_21 = arith.constant 0 : index
    %c0_22 = arith.constant 0 : index
    %39 = vector.load %arg4[%c0_21, %c0_22] : memref<8x4xf32, #tpu.memory_space<vmem>>, vector<8x4xf32>
    tpu.vector_store %arg4[%c0_21, %c0_22], %38 {strides = array<i32>} : memref<8x4xf32, #tpu.memory_space<vmem>>, vector<8x4xf32>,
    return
  }
  func.func @transform_0(%arg0: i32) -> (i32, i32) {
    %c0_i32 = arith.constant 0 : i32
    %c0_i32_0 = arith.constant 0 : i32
    return %arg0, %c0_i32 : i32, i32
  }
  func.func @transform_1(%arg0: i32) -> (i32, i32) {
    %c0_i32 = arith.constant 0 : i32
    %c0_i32_0 = arith.constant 0 : i32
    %c0_i32_1 = arith.constant 0 : i32
    return %c0_i32, %c0_i32_0 : i32, i32
  }
  func.func @transform_2(%arg0: i32) -> (i32, i32) {
    %c0_i32 = arith.constant 0 : i32
    %c0_i32_0 = arith.constant 0 : i32
    %c0_i32_1 = arith.constant 0 : i32
    return %c0_i32, %c0_i32_0 : i32, i32
  }
  func.func @transform_3(%arg0: i32) -> (i32, i32) {
    %c0_i32 = arith.constant 0 : i32
    %c0_i32_0 = arith.constant 0 : i32
    return %arg0, %c0_i32 : i32, i32
  }
}

</mosaic_0001>

<bundles_post_ra>
// kernel: qnet_forward_packed.1
= control target key start
LH: loop header
LB: loop body
LE: loop exit
PB: predicated region body
PF: predicated region fallthrough
CT: control target
= control target key end

     0   :  { %8 = vsyncpa [#allocation3], 0  ;;  %s763_s12 = smov [#allocation2]   ;;  %s864_s0 = inlined_call_operand.vmem [shape: bf16[8,16], index: 0, kind: input, shape index: {}]   ;;  %s865_s1 = inlined_call_operand.hbm [shape: bf16[640,128], index: 1, kind: input, shape index: {}]   ;;  %s866_s2 = inlined_call_operand.vmem [shape: f32[8,128], index: 2, kind: input, shape index: {}]   ;;  %s867_s3 = inlined_call_operand.vmem [shape: f32[8,4], index: 3, kind: output, shape index: {}]  }
   0x1   :  { %s16_s13 = sshll.u32 %s763_s12, 4  ;;  %s739_s16 = scalar_lea.hbm %s865_s1, 5120  ;;  %s17_s13 = int_to_ptr.vmem [resolvable:$true] %s16_s13 }
   0x2   :  { %p740_p0 = scmp.ne.s32.totalorder %s865_s1, %s739_s16  ;;  %p743_p1 = scmp.lt.u32.totalorder %s739_s16, %s865_s1 }
   0x4   :  { %p745_p2 = pnand %p743_p1, %p740_p0 }
   0x6   :  { %748 = shalt.err (!%p745_p2)
}
   0x7   :  { %s749_s21 = scalar_lea.vmem %s17_s13, 5120  ;;  %p754_p4 = scmp.lt.s32.totalorder %s17_s13, %s17_s13 }
   0x8   :  { %p750_p3 = scmp.ne.s32.totalorder %s17_s13, %s749_s21  ;;  %p755_p5 = scmp.lt.s32.totalorder %s749_s21, %s749_s21 }
   0xa   :  { %p756_p6 = por %p755_p5, %p754_p4 }
   0xc   :  { %p757_p7 = pnand %p756_p6, %p750_p3 }
   0xe   :  { %760 = shalt.err (!%p757_p7)
}
   0xf   :  { %s764_s22 = smov 64   ;;  %s765_s23 = smov 4  }
  0x10   :  { %22 = dma.hbm_to_vmem [thread:$0]  %s865_s1, 5120, %s17_s13, [#allocation3], %s764_s22, %s764_s22, %s765_s23  }
  0x11   :  { %761 = dma.done.wait [#allocation3], 5120  }
  0x12   :  { %762 = vsyncadd [#allocation3], 4294962176  ;;  %v766_v0 = vmov 0.0   ;;  %vm767_vm0 = vmmov 0   ;;  %v706_v1 = vld [vmem:[#allocation2] sm:$0xff]   ;;  %vm43_vm1 = vcmask 130048  }
  0x13   :  { %615 = vmatprep.subr.bf16.mxu0 %v766_v0  ;;  %617 = vmatprep.mubr.msk.bf16.mxu0 %vm767_vm0, %v766_v0  ;;  %v29_v2 = vld [vmem:[%s864_s0] sm:$0xf]  ;;  %v708_v4 = vld [vmem:[#allocation2 + $0x48] sm:$0xff]   ;;  %v709_v5 = vld [vmem:[#allocation2 + $0x50] sm:$0xff]   ;;  %vm531_vm2 = vcmask 31744  }
  0x14   :  { %621 = vmatprep.subr.bf16.mxu1 %v766_v0  ;;  %637 = vmatprep.mubr.msk.bf16.mxu1 %vm767_vm0, %v766_v0  ;;  %v707_v3 = vld [vmem:[#allocation2 + $0x40] sm:$0xff]   ;;  %v710_v6 = vld [vmem:[#allocation2 + $0x58] sm:$0xff]   ;;  %v712_v8 = vld [vmem:[#allocation2 + $0x68] sm:$0xff]  }
  0x15   :  { %616 = vmatpush3.bf16.msra.mxu0 %v706_v1  ;;  %622 = vmatpush3.bf16.msra.mxu1 %v707_v3  ;;  %v711_v7 = vld [vmem:[#allocation2 + $0x60] sm:$0xff]   ;;  %v713_v9 = vld [vmem:[#allocation2 + $0x70] sm:$0xff]   ;;  %v714_v10 = vld [vmem:[#allocation2 + $0x78] sm:$0xff]  }
  0x16   :  { %641 = vmatprep.subr.bf16.mxu0 %v766_v0  ;;  %623 = vmatprep.subr.bf16.mxu1 %v766_v0  ;;  %v715_v11 = vld [vmem:[#allocation2 + $0x80] sm:$0xff]   ;;  %v716_v12 = vld [vmem:[#allocation2 + $0x88] sm:$0xff]   ;;  %v717_v13 = vld [vmem:[#allocation2 + $0x90] sm:$0xff]  }
  0x17   :  { %v718_v14 = vld [vmem:[#allocation2 + $0x98] sm:$0xff]   ;;  %v719_v15 = vld [vmem:[#allocation2 + $0xa0] sm:$0xff]   ;;  %v720_v16 = vld [vmem:[#allocation2 + $0xa8] sm:$0xff]  }
  0x18   :  { %618 = vmatmul.mubr.msk.bf16.vlgmr.msra.gmra.mrb[0].mxu0 %vm43_vm1, %v29_v2  ;;  %v538_v17 = vld [vmem:[%s866_s2] ss:$0 sm:$0xff]  ;;  %v721_v25 = vld [vmem:[#allocation2 + $0xb0] sm:$0xff]   ;;  %v722_v26 = vld [vmem:[#allocation2 + $0xb8] sm:$0xff]  }
  0x19   :  { %657 = vmatprep.mubr.msk.bf16.mxu0 %vm767_vm0, %v766_v0  ;;  %624 = vmatpush3.bf16.msra.mxu1 %v708_v4  ;;  %v723_v27 = vld [vmem:[#allocation2 + $0xc0] sm:$0xff]   ;;  %v724_v28 = vld [vmem:[#allocation2 + $0xc8] sm:$0xff]   ;;  %v725_v29 = vld [vmem:[#allocation2 + $0xd0] sm:$0xff]  }
  0x1a   :  { %625 = vmatprep.subr.bf16.mxu1 %v766_v0  ;;  %642 = vmatpush3.bf16.msra.mxu0 %v715_v11  ;;  %v726_v30 = vld [vmem:[#allocation2 + $0xd8] sm:$0xff]   ;;  %v727_v31 = vld [vmem:[#allocation2 + $0xe0] sm:$0xff]   ;;  %v728_v32 = vld [vmem:[#allocation2 + $0xe8] sm:$0xff]  }
  0x1b   :  { %643 = vmatprep.subr.bf16.mxu0 %v766_v0  ;;  %v541_v33 = vld [vmem:[%s866_s2 + $0x1] ss:$0 sm:$0xff]  ;;  %v729_v41 = vld [vmem:[#allocation2 + $0xf0] sm:$0xff]   ;;  %v730_v42 = vld [vmem:[#allocation2 + $0xf8] sm:$0xff]  }
  0x1c   :  { %v731_v43 = vld [vmem:[#allocation2 + $0x100] sm:$0xff]   ;;  %v732_v44 = vld [vmem:[#allocation2 + $0x108] sm:$0xff]   ;;  %v733_v45 = vld [vmem:[#allocation2 + $0x110] sm:$0xff]  }
  0x1d   :  { %626 = vmatpush3.bf16.msra.mxu1 %v709_v5  ;;  %v734_v46 = vld [vmem:[#allocation2 + $0x118] sm:$0xff]   ;;  %v735_v47 = vld [vmem:[#allocation2 + $0x120] sm:$0xff]   ;;  %v736_v48 = vld [vmem:[#allocation2 + $0x128] sm:$0xff]  }
  0x1e   :  { %627 = vmatprep.subr.bf16.mxu1 %v766_v0  ;;  %644 = vmatpush3.bf16.msra.mxu0 %v716_v12  ;;  %v550_v49 = vld [vmem:[%s866_s2 + $0x2] ss:$0 sm:$0xff]  ;;  %v737_v57 = vld [vmem:[#allocation2 + $0x130] sm:$0xff]   ;;  %v738_v58 = vld [vmem:[#allocation2 + $0x138] sm:$0xff]  }
  0x1f   :  { %645 = vmatprep.subr.bf16.mxu0 %v766_v0  ;;  %v559_v59 = vld [vmem:[%s866_s2 + $0x3] ss:$0 sm:$0xff]  ;;  %v568_v4 = vld [vmem:[%s866_s2 + $0x4] ss:$0 sm:$0xff] }
  0x21   :  { %628 = vmatpush3.bf16.msra.mxu1 %v710_v6 }
  0x22   :  { %629 = vmatprep.subr.bf16.mxu1 %v766_v0  ;;  %646 = vmatpush3.bf16.msra.mxu0 %v717_v13 }
  0x23   :  { %647 = vmatprep.subr.bf16.mxu0 %v766_v0 }
  0x25   :  { %630 = vmatpush3.bf16.msra.mxu1 %v711_v7 }
  0x26   :  { %631 = vmatprep.subr.bf16.mxu1 %v766_v0  ;;  %648 = vmatpush3.bf16.msra.mxu0 %v718_v14 }
  0x27   :  { %649 = vmatprep.subr.bf16.mxu0 %v766_v0 }
  0x29   :  { %632 = vmatpush3.bf16.msra.mxu1 %v712_v8 }
  0x2a   :  { %633 = vmatprep.subr.bf16.mxu1 %v766_v0  ;;  %650 = vmatpush3.bf16.msra.mxu0 %v719_v15 }
  0x2b   :  { %651 = vmatprep.subr.bf16.mxu0 %v766_v0 }
  0x2d   :  { %634 = vmatpush3.bf16.msra.mxu1 %v713_v9 }
  0x2e   :  { %635 = vmatprep.subr.bf16.mxu1 %v766_v0  ;;  %652 = vmatpush3.bf16.msra.mxu0 %v720_v16 }
  0x2f   :  { %653 = vmatprep.subr.bf16.mxu0 %v766_v0 }
  0x31   :  { %636 = vmatpush3.bf16.msra.mxu1 %v714_v10 }
  0x32   :  { %661 = vmatprep.subr.bf16.mxu1 %v766_v0  ;;  %654 = vmatpush3.bf16.msra.mxu0 %v721_v25 }
  0x33   :  { %655 = vmatprep.subr.bf16.mxu0 %v766_v0 }
  0x36   :  { %656 = vmatpush3.bf16.msra.mxu0 %v722_v26 }
  0x37   :  { %681 = vmatprep.subr.bf16.mxu0 %v766_v0 }
  0xeb   :  { %v81_v18 = vpop.f32.mrb[0].mxu0 }
  0xec   :  { %v82_v19 = vadd.f32 %v538_v17, %v81_v18  ;;  %v619_v20 = vpop.f32.mrb[1].mxu0 }
  0xed   :  { %v84_v21 = vpop.f32.mrb[2].mxu0 }
  0xee   :  { %v87_v22 = vmax.f32 %v82_v19, 0.0  ;;  %v620_v23 = vpop.f32.mrb[3].mxu0 }
  0xf0   :  { %v88_v24 = vpack.c.bf16 %v87_v22, %v87_v22 }
  0xf2   :  { %638 = vmatmul.mubr.bf16.vlgmr.msra.gmra.mrb[0].mxu1 %v88_v24 }
  0xf3   :  { %677 = vmatprep.mubr.msk.bf16.mxu1 %vm767_vm0, %v766_v0  ;;  %662 = vmatpush3.bf16.msra.mxu1 %v723_v27 }
  0xf4   :  { %663 = vmatprep.subr.bf16.mxu1 %v766_v0 }
  0xf7   :  { %664 = vmatpush3.bf16.msra.mxu1 %v724_v28 }
  0xf8   :  { %665 = vmatprep.subr.bf16.mxu1 %v766_v0 }
  0xfb   :  { %666 = vmatpush3.bf16.msra.mxu1 %v725_v29 }
  0xfc   :  { %667 = vmatprep.subr.bf16.mxu1 %v766_v0 }
  0xff   :  { %668 = vmatpush3.bf16.msra.mxu1 %v726_v30 }
 0x100   :  { %669 = vmatprep.subr.bf16.mxu1 %v766_v0 }
 0x103   :  { %670 = vmatpush3.bf16.msra.mxu1 %v727_v31 }
 0x104   :  { %671 = vmatprep.subr.bf16.mxu1 %v766_v0 }
 0x107   :  { %672 = vmatpush3.bf16.msra.mxu1 %v728_v32 }
 0x108   :  { %673 = vmatprep.subr.bf16.mxu1 %v766_v0 }
 0x10b   :  { %674 = vmatpush3.bf16.msra.mxu1 %v729_v41 }
 0x10c   :  { %675 = vmatprep.subr.bf16.mxu1 %v766_v0 }
 0x10f   :  { %676 = vmatpush3.bf16.msra.mxu1 %v730_v42 }
 0x1c5   :  { %v192_v34 = vpop.f32.mrb[0].mxu1 }
 0x1c6   :  { %v193_v35 = vadd.f32 %v541_v33, %v192_v34  ;;  %v639_v36 = vpop.f32.mrb[1].mxu1 }
 0x1c7   :  { %v195_v37 = vpop.f32.mrb[2].mxu1 }
 0x1c8   :  { %v198_v38 = vmax.f32 %v193_v35, 0.0  ;;  %v640_v39 = vpop.f32.mrb[3].mxu1 }
 0x1ca   :  { %v199_v40 = vpack.c.bf16 %v198_v38, %v198_v38 }
 0x1cc   :  { %658 = vmatmul.mubr.bf16.vlgmr.msra.gmra.mrb[4].mxu0 %v199_v40 }
 0x1cd   :  { %697 = vmatprep.mubr.msk.bf16.mxu0 %vm767_vm0, %v766_v0  ;;  %682 = vmatpush3.bf16.msra.mxu0 %v731_v43 }
 0x1ce   :  { %683 = vmatprep.subr.bf16.mxu0 %v766_v0 }
 0x1d1   :  { %684 = vmatpush3.bf16.msra.mxu0 %v732_v44 }
 0x1d2   :  { %685 = vmatprep.subr.bf16.mxu0 %v766_v0 }
 0x1d5   :  { %686 = vmatpush3.bf16.msra.mxu0 %v733_v45 }
 0x1d6   :  { %687 = vmatprep.subr.bf16.mxu0 %v766_v0 }
 0x1d9   :  { %688 = vmatpush3.bf16.msra.mxu0 %v734_v46 }
 0x1da   :  { %689 = vmatprep.subr.bf16.mxu0 %v766_v0 }
 0x1dd   :  { %690 = vmatpush3.bf16.msra.mxu0 %v735_v47 }
 0x1de   :  { %691 = vmatprep.subr.bf16.mxu0 %v766_v0 }
 0x1e1   :  { %692 = vmatpush3.bf16.msra.mxu0 %v736_v48 }
 0x1e2   :  { %693 = vmatprep.subr.bf16.mxu0 %v766_v0 }
 0x1e5   :  { %694 = vmatpush3.bf16.msra.mxu0 %v737_v57 }
 0x1e6   :  { %695 = vmatprep.subr.bf16.mxu0 %v766_v0 }
 0x1e9   :  { %696 = vmatpush3.bf16.msra.mxu0 %v738_v58 }
 0x29f   :  { %v303_v50 = vpop.f32.mrb[4].mxu0 }
 0x2a0   :  { %v304_v51 = vadd.f32 %v550_v49, %v303_v50  ;;  %v659_v52 = vpop.f32.mrb[5].mxu0 }
 0x2a1   :  { %v306_v53 = vpop.f32.mrb[6].mxu0 }
 0x2a2   :  { %v309_v54 = vmax.f32 %v304_v51, 0.0  ;;  %v660_v55 = vpop.f32.mrb[7].mxu0 }
 0x2a4   :  { %v310_v56 = vpack.c.bf16 %v309_v54, %v309_v54 }
 0x2a6   :  { %678 = vmatmul.mubr.bf16.vlgmr.msra.gmra.mrb[4].mxu1 %v310_v56 }
 0x379   :  { %v414_v60 = vpop.f32.mrb[4].mxu1 }
 0x37a   :  { %v415_v61 = vadd.f32 %v559_v59, %v414_v60  ;;  %v679_v62 = vpop.f32.mrb[5].mxu1 }
 0x37b   :  { %v417_v63 = vpop.f32.mrb[6].mxu1 }
 0x37c   :  { %v420_v1 = vmax.f32 %v415_v61, 0.0  ;;  %v680_v2 = vpop.f32.mrb[7].mxu1 }
 0x37e   :  { %v421_v3 = vpack.c.bf16 %v420_v1, %v420_v1 }
 0x380   :  { %698 = vmatmul.mubr.bf16.vlgmr.msra.gmra.mrb[8].mxu0 %v421_v3 }
 0x453   :  { %v525_v5 = vpop.f32.mrb[8].mxu0 }
 0x454   :  { %v526_v0 = vadd.f32 %v568_v4, %v525_v5  ;;  %v699_v6 = vpop.f32.mrb[9].mxu0 }
 0x455   :  { %v528_v7 = vpop.f32.mrb[10].mxu0 }
 0x456   :  { %532 = vst.msk [vmem:[%s867_s3] sm:$0xff] %vm531_vm2, %v526_v0  ;;  %v700_v8 = vpop.f32.mrb[11].mxu0 }
 0x457   :  { %537 = vsyncpa [#allocation3], 1 }

</bundles_post_ra>
